<compile_context>
chip_gen: v6e
topology: v6e:2x2x1
jax: 0.10.0
libtpu: 0.0.40
codegen_flags: <defaults>
</compile_context>

<pallas_src>
import functools

import jax
import jax.numpy as jnp
from jax import lax
from jax.experimental import pallas as pl
from jax.experimental.pallas import tpu as pltpu

NEG_INF = -1e30
LANE = 128


def _round_up(x, m):
    return (x + m - 1) // m * m


# ----------------------------------------------------------------------------
# Pass 1 (per layer): projection + attention scores, computed once.
#   xw     = x @ W                 (N, HC_pad)  value matrix (pad lanes = 0)
#   a_srcT = per-head src scores   (H, N)       produced already transposed
#   a_dst  = per-head dst scores   (N, H)
# ----------------------------------------------------------------------------
def proj_kernel(x_ref, w_ref, asT_ref, ad_ref, xw_ref, a_srcT_ref, a_dst_ref):
    # f32 matmuls (bf16 x bf16 = f32 dots are unsupported on the interpret/CPU
    # backend; on real TPU the operands could be cast to bf16 for the MXU).
    xw = jnp.dot(x_ref[...], w_ref[...], preferred_element_type=jnp.float32)
    xw_ref[...] = xw
    # (H, HC_pad) . (TM, HC_pad) contracted on the last dims -> (H, TM):
    # source scores come out already transposed -> lane-dense, no XLU relayout.
    a_srcT_ref[...] = lax.dot_general(
        asT_ref[...], xw, (((1,), (1,)), ((), ())),
        preferred_element_type=jnp.float32)
    a_dst_ref[...] = jnp.dot(xw, ad_ref[...], preferred_element_type=jnp.float32)


def project(x, w_pad, asT_pad, ad_pad, *, tm):
    n, f_in = x.shape
    hc_pad = w_pad.shape[1]
    heads = asT_pad.shape[0]
    assert n % tm == 0
    inv = pl.Buffered(1)  # grid-invariant operands: no double buffering
    return pl.pallas_call(
        proj_kernel,
        grid=(n // tm,),
        in_specs=[
            pl.BlockSpec((tm, f_in), lambda i: (i, 0)),                        # x tile
            pl.BlockSpec((f_in, hc_pad), lambda i: (0, 0), pipeline_mode=inv),  # W
            pl.BlockSpec((heads, hc_pad), lambda i: (0, 0), pipeline_mode=inv), # att_src^T
            pl.BlockSpec((hc_pad, heads), lambda i: (0, 0), pipeline_mode=inv), # att_dst
        ],
        out_specs=[
            pl.BlockSpec((tm, hc_pad), lambda i: (i, 0)),
            pl.BlockSpec((heads, tm), lambda i: (0, i)),
            pl.BlockSpec((tm, heads), lambda i: (i, 0)),
        ],
        out_shape=[
            jax.ShapeDtypeStruct((n, hc_pad), jnp.float32),
            jax.ShapeDtypeStruct((heads, n), jnp.float32),
            jax.ShapeDtypeStruct((n, heads), jnp.float32),
        ],
        compiler_params=pltpu.CompilerParams(
            dimension_semantics=("parallel",),
            vmem_limit_bytes=32 * 1024 * 1024),
    )(x, w_pad, asT_pad, ad_pad)


# ----------------------------------------------------------------------------
# Pass 2 (per layer): masked attention softmax + aggregation.
# Grid = (dst row tiles [parallel], src chunks [arbitrary]); online softmax.
# ----------------------------------------------------------------------------
def gat_attention_kernel(a_dst_ref, a_srcT_ref, xw_ref, adj_ref, b_ref, out_ref,
                         m_sc, l_sc, acc_sc, *,
                         heads, c_out, apply_relu, apply_log_softmax):
    k = pl.program_id(1)

    @pl.when(k == 0)
    def _init():
        m_sc[...] = jnp.full_like(m_sc, NEG_INF)
        l_sc[...] = jnp.zeros_like(l_sc)
        acc_sc[...] = jnp.zeros_like(acc_sc)

    a_dst = a_dst_ref[...]        # (TM, H)
    a_srcT = a_srcT_ref[...]      # (H, TK)
    xw = xw_ref[...]              # (TK, HC_pad)
    mask = adj_ref[...] != 0      # (TM, TK) int8 -> bool

    for h in range(heads):        # static unroll over heads
        sl = slice(h * c_out, (h + 1) * c_out)
        # e[i, j] = leaky_relu(a_dst[i, h] + a_src[j, h]), slope 0.2 (PyG default)
        e = a_dst[:, h:h + 1] + a_srcT[h:h + 1, :]                    # (TM, TK)
        e = jnp.where(e > 0.0, e, 0.2 * e)
        e = jnp.where(mask, e, NEG_INF)
        m_prev = m_sc[:, h:h + 1]
        m_new = jnp.maximum(m_prev, jnp.max(e, axis=-1, keepdims=True))
        # explicit mask on p: safe even when a whole chunk is masked out
        p = jnp.where(mask, jnp.exp(e - m_new), 0.0)                  # (TM, TK)
        alpha = jnp.exp(m_prev - m_new)
        l_sc[:, h:h + 1] = alpha * l_sc[:, h:h + 1] + jnp.sum(p, axis=-1,
                                                              keepdims=True)
        acc_sc[:, sl] = alpha * acc_sc[:, sl] + jnp.dot(
            p, xw[:, sl], preferred_element_type=jnp.float32)
        m_sc[:, h:h + 1] = m_new

    @pl.when(k == pl.num_programs(1) - 1)
    def _finalize():
        for h in range(heads):
            sl = slice(h * c_out, (h + 1) * c_out)
            acc_sc[:, sl] = acc_sc[:, sl] / l_sc[:, h:h + 1]   # exact softmax norm
        out = acc_sc[...] + b_ref[...]                         # bias added once
        if apply_relu:
            out = jnp.maximum(out, 0.0)
        if apply_log_softmax:
            hc = heads * c_out
            lane = lax.broadcasted_iota(jnp.int32, out.shape, 1)
            valid = lane < hc                                  # ignore pad lanes
            z = jnp.where(valid, out, NEG_INF)
            zmax = jnp.max(z, axis=-1, keepdims=True)
            ez = jnp.where(valid, jnp.exp(z - zmax), 0.0)
            lse = jnp.log(jnp.sum(ez, axis=-1, keepdims=True))
            out = jnp.where(valid, z - zmax - lse, 0.0)
        out_ref[...] = out.astype(out_ref.dtype)               # one lane-dense store


def gat_attention(a_dst, a_srcT, xw, adj_i8, b_pad, *, heads, c_out, tm, tk,
                  apply_relu=False, apply_log_softmax=False):
    n = a_dst.shape[0]
    hc_pad = xw.shape[1]
    assert n % tm == 0 and n % tk == 0
    if apply_log_softmax:
        assert heads == 1, "log_softmax epilogue only valid for single-head layer"
    kernel = functools.partial(
        gat_attention_kernel, heads=heads, c_out=c_out,
        apply_relu=apply_relu, apply_log_softmax=apply_log_softmax)
    return pl.pallas_call(
        kernel,
        grid=(n // tm, n // tk),
        in_specs=[
            pl.BlockSpec((tm, heads), lambda i, k: (i, 0)),     # a_dst (this tile)
            pl.BlockSpec((heads, tk), lambda i, k: (0, k)),     # a_src^T chunk
            pl.BlockSpec((tk, hc_pad), lambda i, k: (k, 0)),    # value chunk
            pl.BlockSpec((tm, tk), lambda i, k: (i, k)),        # adj tile (int8)
            pl.BlockSpec((1, hc_pad), lambda i, k: (0, 0),
                         pipeline_mode=pl.Buffered(1)),         # bias (invariant)
        ],
        out_specs=pl.BlockSpec((tm, hc_pad), lambda i, k: (i, 0)),
        out_shape=jax.ShapeDtypeStruct((n, hc_pad), jnp.float32),
        scratch_shapes=[
            pltpu.VMEM((tm, heads), jnp.float32),    # running max per head
            pltpu.VMEM((tm, heads), jnp.float32),    # running denom per head
            pltpu.VMEM((tm, hc_pad), jnp.float32),   # running weighted sum (all heads)
        ],
        compiler_params=pltpu.CompilerParams(
            dimension_semantics=("parallel", "arbitrary"),
            vmem_limit_bytes=32 * 1024 * 1024),
    )(a_dst, a_srcT, xw, adj_i8, b_pad)


# ----------------------------------------------------------------------------
# Host-side prep / full forward
# ----------------------------------------------------------------------------
def _block_diag_att(att):
    """(c, heads) per-head attention vectors -> (heads*c, heads) block matrix
    so that xw @ out gives all heads' scores in one matmul.
    (The H-1 zero blocks per head are one-shot K-work in the projection pass.)"""
    c, heads = att.shape
    eye = jnp.eye(heads, dtype=att.dtype)
    return (att.T[:, :, None] * eye[:, None, :]).reshape(heads * c, heads)


def _prep_layer(w, att_src, att_dst, b, *, heads, c_out, in_dim):
    """Pad everything to a 128-lane-multiple output width (zero pad lanes)."""
    hc = heads * c_out
    hc_pad = _round_up(hc, LANE)
    w_pad = jnp.zeros((in_dim, hc_pad), jnp.float32).at[:w.shape[0], :hc].set(w)
    as_bd = _block_diag_att(att_src)                      # (hc, heads)
    ad_bd = _block_diag_att(att_dst)
    asT_pad = jnp.zeros((heads, hc_pad), jnp.float32).at[:, :hc].set(as_bd.T)
    ad_pad = jnp.zeros((hc_pad, heads), jnp.float32).at[:hc, :].set(ad_bd)
    b_pad = jnp.zeros((1, hc_pad), jnp.float32).at[:, :hc].set(b)
    return w_pad, asT_pad, ad_pad, b_pad, hc_pad


def gat_forward(x, adj_i8, params, *, tile=128):
    # tile: destination-row tile TM == source-chunk TK.  128 works on all gens;
    # raise to 256 on v6e/v5e (128 MiB VMEM) for better roofline utilization.
    heads = params["heads"]
    c1 = params["hidden"]
    c2 = params["w2"].shape[1]
    n = x.shape[0]

    # Pad node count to a tile multiple; pad rows get a self-loop so their
    # softmax denominator is nonzero (kept finite, sliced off at the end).
    n_pad = max(_round_up(n, tile), tile)
    x = x.astype(jnp.float32)
    adj_i8 = adj_i8.astype(jnp.int8)
    if n_pad != n:
        x = jnp.pad(x, ((0, n_pad - n), (0, 0)))
        adj_i8 = jnp.pad(adj_i8, ((0, n_pad - n), (0, n_pad - n)))
        idx = jnp.arange(n, n_pad)
        adj_i8 = adj_i8.at[idx, idx].set(1)

    # ---- layer 1: GATConv(F_in -> c1, heads, concat=True) + ReLU ----
    w1p, as1T, ad1p, b1p, hc1_pad = _prep_layer(
        params["w1"], params["as1"], params["ad1"], params["b1"],
        heads=heads, c_out=c1, in_dim=x.shape[1])
    xw1, a_srcT1, a_dst1 = project(x, w1p, as1T, ad1p, tm=tile)
    h1 = gat_attention(a_dst1, a_srcT1, xw1, adj_i8, b1p,
                       heads=heads, c_out=c1, tm=tile, tk=tile,
                       apply_relu=True)
    # h1: (n_pad, hc1_pad); lanes >= heads*c1 are exactly zero, so it can feed
    # layer 2 directly through zero-padded weight rows (no slice / copy).
    # (Dropout p=0.5 is identity at inference.)

    # ---- layer 2: GATConv(heads*c1 -> c2, 1 head, concat=False) + log_softmax ----
    w2p, as2T, ad2p, b2p, _ = _prep_layer(
        params["w2"], params["as2"], params["ad2"], params["b2"],
        heads=1, c_out=c2, in_dim=hc1_pad)
    xw2, a_srcT2, a_dst2 = project(h1, w2p, as2T, ad2p, tm=tile)
    out = gat_attention(a_dst2, a_srcT2, xw2, adj_i8, b2p,
                        heads=1, c_out=c2, tm=tile, tk=tile,
                        apply_log_softmax=True)
    return out[:n, :c2]


def init_params(key, in_channels, hidden, out_channels, heads):
    ks = jax.random.split(key, 8)
    glorot = lambda k, shape: (jax.random.normal(k, shape, jnp.float32)
                               * (2.0 / sum(shape)) ** 0.5)
    return {
        "heads": heads,
        "hidden": hidden,
        "w1": glorot(ks[0], (in_channels, heads * hidden)),
        "as1": glorot(ks[1], (hidden, heads)),
        "ad1": glorot(ks[2], (hidden, heads)),
        "b1": jnp.zeros((1, heads * hidden), jnp.float32),
        "w2": glorot(ks[3], (heads * hidden, out_channels)),
        "as2": glorot(ks[4], (out_channels, 1)),
        "ad2": glorot(ks[5], (out_channels, 1)),
        "b2": jnp.zeros((1, out_channels), jnp.float32),
    }


def build_adjacency(edge_index, num_nodes):
    """edge_index: (2, E), row 0 = src, row 1 = dst.
    Returns int8 mask adj[i, j] = 1 iff edge j -> i, plus self-loops."""
    adj = jnp.zeros((num_nodes, num_nodes), jnp.int8)
    adj = adj.at[edge_index[1], edge_index[0]].set(1)
    adj = adj.at[jnp.arange(num_nodes), jnp.arange(num_nodes)].set(1)
    return adj


# ----------------------------------------------------------------------------
# Pure-JAX reference (inference semantics) for a correctness check.
# ----------------------------------------------------------------------------
def gat_reference(x, adj, params):
    mask = adj != 0

    def conv(xin, w, att_s, att_d, b, heads, c):
        xw = xin @ w
        xw3 = xw.reshape(xin.shape[0], heads, c)
        a_s = (xw3 * att_s.T[None]).sum(-1)      # (N, H)
        a_d = (xw3 * att_d.T[None]).sum(-1)      # (N, H)
        outs = []
        for h in range(heads):
            e = a_d[:, h:h + 1] + a_s[:, h][None, :]
            e = jnp.where(e > 0, e, 0.2 * e)
            e = jnp.where(mask, e, NEG_INF)
            attn = jax.nn.softmax(e, axis=-1)
            outs.append(attn @ xw3[:, h, :])
        return jnp.concatenate(outs, axis=-1) + b

    h1 = jax.nn.relu(conv(x, params["w1"], params["as1"], params["ad1"],
                          params["b1"], params["heads"], params["hidden"]))
    o = conv(h1, params["w2"], params["as2"], params["ad2"],
             params["b2"], 1, params["w2"].shape[1])
    return jax.nn.log_softmax(o, axis=-1)


if __name__ == "__main__":
    key = jax.random.PRNGKey(0)
    k_x, k_e, k_p = jax.random.split(key, 3)

    # Small synthetic graph; node count deliberately NOT a tile multiple so the
    # padding path is exercised (200 -> padded to 256, grid (2, 2)).
    N, IN_CH, HIDDEN, OUT_CH, HEADS = 200, 16, 8, 4, 8
    x = jax.random.uniform(k_x, (N, IN_CH), jnp.float32)

    # ring graph + random chords, both directions
    src_ring = jnp.arange(N, dtype=jnp.int32)
    dst_ring = (src_ring + 1) % N
    src_rand = jax.random.randint(k_e, (64,), 0, N, jnp.int32)
    dst_rand = (src_rand + 5) % N
    src = jnp.concatenate([src_ring, dst_ring, src_rand])
    dst = jnp.concatenate([dst_ring, src_ring, dst_rand])
    edge_index = jnp.stack([src, dst])          # (2, E)

    adj = build_adjacency(edge_index, N)
    params = init_params(k_p, IN_CH, HIDDEN, OUT_CH, HEADS)

    out = gat_forward(x, adj, params, tile=128)
    jax.block_until_ready(out)

    assert out.shape == (N, OUT_CH)
    assert bool(jnp.all(jnp.isfinite(out)))
    # rows of log_softmax exp-sum to 1
    assert jnp.allclose(jnp.exp(out).sum(axis=1), 1.0, atol=1e-3)
    # parity with the pure-JAX reference
    ref = gat_reference(x, adj, params)
    assert jnp.allclose(out, ref, atol=2e-3, rtol=2e-3)
    print("KERNEL_OK")
</pallas_src>

<mosaic_0001>
module attributes {stable_mosaic.version = 11 : i64} {
  func.func @proj_kernel(%arg0: i32, %arg1: memref<128x16xf32, #tpu.memory_space<vmem>>, %arg2: memref<16x128xf32, #tpu.memory_space<vmem>>, %arg3: memref<8x128xf32, #tpu.memory_space<vmem>>, %arg4: memref<128x8xf32, #tpu.memory_space<vmem>>, %arg5: memref<128x128xf32, #tpu.memory_space<vmem>>, %arg6: memref<8x128xf32, #tpu.memory_space<vmem>>, %arg7: memref<128x8xf32, #tpu.memory_space<vmem>>) attributes {dimension_semantics = [#tpu.dimension_semantics<parallel>], iteration_bounds = array<i64: 2>, scalar_prefetch = 0 : i64, scratch_operands = 0 : i64, tpu.core_type = #tpu.core_type<tc>, window_params = [{transform_indices = @transform_0, window_bounds = array<i64: 128, 16>}, {pipeline_mode = #tpu.pipeline_mode<synchronous>, transform_indices = @transform_1, window_bounds = array<i64: 16, 128>}, {pipeline_mode = #tpu.pipeline_mode<synchronous>, transform_indices = @transform_2, window_bounds = array<i64: 8, 128>}, {pipeline_mode = #tpu.pipeline_mode<synchronous>, transform_indices = @transform_3, window_bounds = array<i64: 128, 8>}, {transform_indices = @transform_4, window_bounds = array<i64: 128, 128>}, {transform_indices = @transform_5, window_bounds = array<i64: 8, 128>}, {transform_indices = @transform_6, window_bounds = array<i64: 128, 8>}]} {
    %c0 = arith.constant 0 : index
    %c0_0 = arith.constant 0 : index
    %0 = vector.load %arg1[%c0, %c0_0] : memref<128x16xf32, #tpu.memory_space<vmem>>, vector<128x16xf32>
    %c0_1 = arith.constant 0 : index
    %c0_2 = arith.constant 0 : index
    %1 = vector.load %arg2[%c0_1, %c0_2] : memref<16x128xf32, #tpu.memory_space<vmem>>, vector<16x128xf32>
    %cst = arith.constant dense<0.000000e+00> : vector<128x128xf32>
    %2 = tpu.matmul %0, %1, %cst {dimension_numbers = #tpu.dot_dimension_numbers<[1], [0], [0], [1], [0, 0, 1, 1], [], []>} : vector<128x16xf32>, vector<16x128xf32>, vector<128x128xf32> -> vector<128x128xf32>
    %c0_3 = arith.constant 0 : index
    %c0_4 = arith.constant 0 : index
    %3 = vector.load %arg5[%c0_3, %c0_4] : memref<128x128xf32, #tpu.memory_space<vmem>>, vector<128x128xf32>
    tpu.vector_store %arg5[%c0_3, %c0_4], %2 {strides = array<i32>} : memref<128x128xf32, #tpu.memory_space<vmem>>, vector<128x128xf32>,
    %c0_5 = arith.constant 0 : index
    %c0_6 = arith.constant 0 : index
    %4 = vector.load %arg3[%c0_5, %c0_6] : memref<8x128xf32, #tpu.memory_space<vmem>>, vector<8x128xf32>
    %cst_7 = arith.constant dense<0.000000e+00> : vector<8x128xf32>
    %5 = tpu.matmul %4, %2, %cst_7 {dimension_numbers = #tpu.dot_dimension_numbers<[1], [1], [0], [0], [0, 0, 1, 0], [], []>} : vector<8x128xf32>, vector<128x128xf32>, vector<8x128xf32> -> vector<8x128xf32>
    %c0_8 = arith.constant 0 : index
    %c0_9 = arith.constant 0 : index
    %6 = vector.load %arg6[%c0_8, %c0_9] : memref<8x128xf32, #tpu.memory_space<vmem>>, vector<8x128xf32>
    tpu.vector_store %arg6[%c0_8, %c0_9], %5 {strides = array<i32>} : memref<8x128xf32, #tpu.memory_space<vmem>>, vector<8x128xf32>,
    %c0_10 = arith.constant 0 : index
    %c0_11 = arith.constant 0 : index
    %7 = vector.load %arg4[%c0_10, %c0_11] : memref<128x8xf32, #tpu.memory_space<vmem>>, vector<128x8xf32>
    %cst_12 = arith.constant dense<0.000000e+00> : vector<128x8xf32>
    %8 = tpu.matmul %2, %7, %cst_12 {dimension_numbers = #tpu.dot_dimension_numbers<[1], [0], [0], [1], [0, 0, 1, 1], [], []>} : vector<128x128xf32>, vector<128x8xf32>, vector<128x8xf32> -> vector<128x8xf32>
    %c0_13 = arith.constant 0 : index
    %c0_14 = arith.constant 0 : index
    %9 = vector.load %arg7[%c0_13, %c0_14] : memref<128x8xf32, #tpu.memory_space<vmem>>, vector<128x8xf32>
    tpu.vector_store %arg7[%c0_13, %c0_14], %8 {strides = array<i32>} : memref<128x8xf32, #tpu.memory_space<vmem>>, vector<128x8xf32>,
    return
  }
  func.func @transform_0(%arg0: i32) -> (i32, i32) {
    %c0_i32 = arith.constant 0 : i32
    %c0_i32_0 = arith.constant 0 : i32
    return %arg0, %c0_i32 : i32, i32
  }
  func.func @transform_1(%arg0: i32) -> (i32, i32) {
    %c0_i32 = arith.constant 0 : i32
    %c0_i32_0 = arith.constant 0 : i32
    %c0_i32_1 = arith.constant 0 : i32
    return %c0_i32, %c0_i32_0 : i32, i32
  }
  func.func @transform_2(%arg0: i32) -> (i32, i32) {
    %c0_i32 = arith.constant 0 : i32
    %c0_i32_0 = arith.constant 0 : i32
    %c0_i32_1 = arith.constant 0 : i32
    return %c0_i32, %c0_i32_0 : i32, i32
  }
  func.func @transform_3(%arg0: i32) -> (i32, i32) {
    %c0_i32 = arith.constant 0 : i32
    %c0_i32_0 = arith.constant 0 : i32
    %c0_i32_1 = arith.constant 0 : i32
    return %c0_i32, %c0_i32_0 : i32, i32
  }
  func.func @transform_4(%arg0: i32) -> (i32, i32) {
    %c0_i32 = arith.constant 0 : i32
    %c0_i32_0 = arith.constant 0 : i32
    return %arg0, %c0_i32 : i32, i32
  }
  func.func @transform_5(%arg0: i32) -> (i32, i32) {
    %c0_i32 = arith.constant 0 : i32
    %c0_i32_0 = arith.constant 0 : i32
    return %c0_i32, %arg0 : i32, i32
  }
  func.func @transform_6(%arg0: i32) -> (i32, i32) {
    %c0_i32 = arith.constant 0 : i32
    %c0_i32_0 = arith.constant 0 : i32
    return %arg0, %c0_i32 : i32, i32
  }
}

</mosaic_0001>

<bundles_post_ra>
// kernel: tpu_custom_call.1
= control target key start
LH: loop header
LB: loop body
LE: loop exit
PB: predicated region body
PF: predicated region fallthrough
CT: control target
= control target key end

     0   :  { %12 = vsyncpa [#allocation3], 0  ;;  %s1641_s0 = inlined_call_operand.vmem [shape: f32[256,16], index: 0, kind: input, shape index: {}]   ;;  %s1642_s1 = inlined_call_operand.vmem [shape: f32[16,128], index: 1, kind: input, shape index: {}]   ;;  %s1643_s2 = inlined_call_operand.vmem [shape: f32[8,128], index: 2, kind: input, shape index: {}]   ;;  %s1644_s3 = inlined_call_operand.vmem [shape: f32[128,8], index: 3, kind: input, shape index: {}]   ;;  %s1645_s4 = inlined_call_operand.hbm [shape: f32[256,128], index: 4, kind: output, shape index: {0}]   ;;  %s1646_s5 = inlined_call_operand.hbm [shape: f32[8,256], index: 5, kind: output, shape index: {1}]   ;;  %s1647_s6 = inlined_call_operand.vmem [shape: f32[256,8], index: 6, kind: output, shape index: {2}]  }
   0x1   :  { %14 = vsyncpa [#allocation3 + $0x1], 0 }
   0x2   :  { %15 = vsyncpa [#allocation5], 0 }
   0x3   :  { %17 = vsyncpa [#allocation5 + $0x1], 0  ;;  %s1316_s21 = smov 0   ;;  %s1318_s22 = smov 0  }
   0x4   :  { %s1320_s23 = smov 0   ;;  %s1322_s24 = smov 0  }
   0x5 LB: > { %s1337_s25 = sadd.s32 4294967295, %s1273_s24   ;;  %s915_s26 = sadd.s32 4294967294, %s1273_s24   ;;  %s1273_s24 = sphi %s1322_s24, %s1653_s24   ;;  %s1269_s23 = sphi %s1320_s23, %s1652_s23   ;;  %s1265_s22 = sphi %s1318_s22, %s1651_s22   ;;  %s1261_s21 = sphi %s1316_s21, %s1650_s21  }
   0x6   : > { %s1341_s27 = sadd.s32 1, %s1273_s24   ;;  %s119_s28 = sadd.s32 1, %s1269_s23 }
   0x7   : > { %s116_s29 = ssub.s32 %s1273_s24, %s1341_s27  ;;  %p129_p0 = scmp.ne.s32.totalorder %s1269_s23, %s1265_s22 }
   0x8   : > { %p117_p1 = scmp.eq.s32.totalorder %s116_s29, 0  ;;  %p130_p2 = scmp.eq.s32.totalorder %s1337_s25, 1 }
   0x9   : > { %p135_p3 = scmp.ne.s32.totalorder %s1265_s22, %s1261_s21  ;;  %p136_p4 = scmp.eq.s32.totalorder %s915_s26, 1 }
   0xa   : > { %s1352_s30 = scalar_select %p117_p1, %s1269_s23, %s119_s28  }
   0xb   : > { %p1354_p5 = por %p130_p2, %p129_p0  ;;  %p1358_p6 = por %p136_p4, %p135_p3 }
   0xc   : > { %p918_p7 = scmp.ge.s32.totalorder %s1273_s24, 1  ;;  %p224_p8 = scmp.lt.s32.totalorder %s1273_s24, 3 }
   0xe   : > { %p225_p9 = pnand %p918_p7, %p224_p8 }
   0xf   : > { %s921_s13 = sshll.u32 (!%p225_p9), %s1337_s25, 4  ;;  %s948_s17 = sshll.u32 (!%p225_p9), %s1337_s25, 11 }
  0x10   : > { %228 = sbr.rel (%p225_p9) target bundleno = 517 (0x205), region = 36  ;;  %p265_p10 = scmp.lt.s32.totalorder (!%p225_p9), %s921_s13, 31 }
  0x11   : > { %s1527_s26 = scalar_lea.hbm (!%p225_p9), %s1645_s4, %s948_s17  ;;  %s1277_s10 = smov (!%p225_p9), [#allocation2]  }
  0x15   : > { %v294_v0 = vld [vmem:[%s1642_s1 + $0x8] sm:$0xff]  ;;  %v293_v1 = vld [vmem:[%s1642_s1] sm:$0xff]  ;;  %v592_v2 = vld [vmem:[%s1644_s3 + $0x78] sm:$0xff]  ;;  %s1655_s13 = smov (!%p265_p10, %s921_s13), 31  ;;  %vm295_vm0 = vcmask 130048   ;;  %v1275_v34 = vmov 0.0  }
  0x16   : > { %1016 = vmatprep.subr.mxu0 %v294_v0  ;;  %s922_s16 = sshll.u32 %s1655_s13, 3  ;;  %v591_v6 = vld [vmem:[%s1644_s3 + $0x70] sm:$0xff]  ;;  %v590_v8 = vld [vmem:[%s1644_s3 + $0x68] sm:$0xff]  ;;  %v589_v10 = vld [vmem:[%s1644_s3 + $0x60] sm:$0xff]  ;;  %1044 = vmatprep.subr.mxu1 %v1275_v34  ;;  %vm1276_vm1 = vmmov 0  }
  0x17   : > { %1017 = vmatpush3.msra.mxu0 %v294_v0  ;;  %s1382_s19 = scalar_lea.vmem %s1641_s0, %s922_s16  ;;  %v588_v12 = vld [vmem:[%s1644_s3 + $0x58] sm:$0xff]  ;;  %v587_v14 = vld [vmem:[%s1644_s3 + $0x50] sm:$0xff]  ;;  %v586_v16 = vld [vmem:[%s1644_s3 + $0x48] sm:$0xff]  ;;  %1076 = vmatprep.mubr.msk.f32.mxu1 %vm1276_vm1, %v1275_v34 }
  0x18   : > { %1018 = vmatprep.subr.mxu0 %v293_v1  ;;  %v277_v3 = vld [vmem:[%s1382_s19] sm:$0xff]  ;;  %v278_v4 = vld [vmem:[%s1382_s19 + $0x8] sm:$0xff]  ;;  %v279_v5 = vld [vmem:[%s1382_s19 + $0x10] sm:$0xff] }
  0x19   : > { %1019 = vmatpush3.msra.mxu0 %v293_v1  ;;  %1020 = vmatprep.mubr.msk.f32.mxu0 %vm295_vm0, %v277_v3  ;;  %v280_v7 = vld [vmem:[%s1382_s19 + $0x18] sm:$0xff]  ;;  %v281_v9 = vld [vmem:[%s1382_s19 + $0x20] sm:$0xff]  ;;  %v282_v11 = vld [vmem:[%s1382_s19 + $0x28] sm:$0xff] }
  0x1a   : > { %1079 = vmatprep.subr.mxu0 %v592_v2  ;;  %1021 = vmatmul.mubr.msk.f32.vlgmr.msra.gmra.mxu0 %vm295_vm0, %v278_v4  ;;  %v283_v13 = vld [vmem:[%s1382_s19 + $0x30] sm:$0xff]  ;;  %v284_v15 = vld [vmem:[%s1382_s19 + $0x38] sm:$0xff]  ;;  %v285_v17 = vld [vmem:[%s1382_s19 + $0x40] sm:$0xff] }
  0x1b   : > { %1023 = vmatprep.mubr.msk.f32.mxu0 %vm295_vm0, %v279_v5  ;;  %1080 = vmatpush3.msra.mxu0 %v592_v2  ;;  %v585_v18 = vld [vmem:[%s1644_s3 + $0x40] sm:$0xff]  ;;  %v286_v19 = vld [vmem:[%s1382_s19 + $0x48] sm:$0xff]  ;;  %v584_v20 = vld [vmem:[%s1644_s3 + $0x38] sm:$0xff] }
  0x1c   : > { %1081 = vmatprep.subr.mxu0 %v591_v6  ;;  %v287_v21 = vld [vmem:[%s1382_s19 + $0x50] sm:$0xff]  ;;  %v288_v23 = vld [vmem:[%s1382_s19 + $0x58] sm:$0xff]  ;;  %v582_v24 = vld [vmem:[%s1644_s3 + $0x28] sm:$0xff] }
  0x1d   : > { %1082 = vmatpush3.msra.mxu0 %v591_v6  ;;  %v583_v22 = vld [vmem:[%s1644_s3 + $0x30] sm:$0xff]  ;;  %v289_v25 = vld [vmem:[%s1382_s19 + $0x60] sm:$0xff]  ;;  %v290_v27 = vld [vmem:[%s1382_s19 + $0x68] sm:$0xff] }
  0x1e   : > { %1024 = vmatmul.mubr.msk.f32.gmra.mxu0 %vm295_vm0, %v280_v7  ;;  %1083 = vmatprep.subr.mxu0 %v590_v8  ;;  %v581_v26 = vld [vmem:[%s1644_s3 + $0x20] sm:$0xff]  ;;  %v580_v28 = vld [vmem:[%s1644_s3 + $0x18] sm:$0xff]  ;;  %v291_v29 = vld [vmem:[%s1382_s19 + $0x70] sm:$0xff] }
  0x1f   : > { %1026 = vmatprep.mubr.msk.f32.mxu0 %vm295_vm0, %v281_v9  ;;  %1084 = vmatpush3.msra.mxu0 %v590_v8  ;;  %v579_v30 = vld [vmem:[%s1644_s3 + $0x10] sm:$0xff]  ;;  %v292_v31 = vld [vmem:[%s1382_s19 + $0x78] sm:$0xff]  ;;  %v578_v32 = vld [vmem:[%s1644_s3 + $0x8] sm:$0xff]  ;;  %s1464_s19 = sand.u32 1, %s1265_s22  }
  0x20   : > { %1085 = vmatprep.subr.mxu0 %v589_v10  ;;  %v577_v33 = vld [vmem:[%s1644_s3] sm:$0xff]  ;;  %s919_s11 = sshll.u32 %s1464_s19, 7  ;;  %s756_s29 = scalar_lea.sflag [#allocation3], %s1464_s19 }
  0x21   : > { %1086 = vmatpush3.msra.mxu0 %v589_v10  ;;  %s1469_s12 = scalar_lea.vmem [#allocation2], %s919_s11  ;;  %v505_v51 = vld [vmem:[%s1643_s2] sm:$0xff]  ;;  %s1187_s11 = sshll.u32 %s1277_s10, 4  ;;  %s1188_s11 = int_to_ptr.vmem [resolvable:$false] %s1187_s11 }
  0x22   : > { %1027 = vmatmul.mubr.msk.f32.gmra.mxu0 %vm295_vm0, %v282_v11  ;;  %1087 = vmatprep.subr.mxu0 %v588_v12  ;;  %s779_s28 = sshll.u32 %s1469_s12, 4  ;;  %s1189_s14 = scalar_lea.vmem %s1188_s11, 4096  ;;  %s1530_s28 = int_to_ptr.vmem [resolvable:$true] %s779_s28 }
  0x23   : > { %1029 = vmatprep.mubr.msk.f32.mxu0 %vm295_vm0, %v283_v13  ;;  %1088 = vmatpush3.msra.mxu0 %v588_v12  ;;  %s1183_s9 = scalar_lea.vmem %s1530_s28, 2048  ;;  %p1190_p0 = scmp.lt.s32.totalorder %s1530_s28, %s1188_s11 }
  0x24   : > { %1089 = vmatprep.subr.mxu0 %v587_v14  ;;  %p1184_p11 = scmp.ne.s32.totalorder %s1530_s28, %s1183_s9  ;;  %p1191_p1 = scmp.lt.s32.totalorder %s1189_s14, %s1183_s9 }
  0x25   : > { %1090 = vmatpush3.msra.mxu0 %v587_v14 }
  0x26   : > { %1030 = vmatmul.mubr.msk.f32.gmra.mxu0 %vm295_vm0, %v284_v15  ;;  %1091 = vmatprep.subr.mxu0 %v586_v16  ;;  %p1185_p12 = pnand %p1184_p11, %p1354_p5  ;;  %p1192_p2 = por %p1191_p1, %p1190_p0 }
  0x27   : > { %1032 = vmatprep.mubr.msk.f32.mxu0 %vm295_vm0, %v285_v17  ;;  %1092 = vmatpush3.msra.mxu0 %v586_v16 }
  0x28   : > { %1093 = vmatprep.subr.mxu0 %v585_v18  ;;  %p1186_p13 = pneg %p1185_p12 }
  0x29   : > { %1094 = vmatpush3.msra.mxu0 %v585_v18 }
  0x2a   : > { %1033 = vmatmul.mubr.msk.f32.gmra.mxu0 %vm295_vm0, %v286_v19  ;;  %1095 = vmatprep.subr.mxu0 %v584_v20  ;;  %p1193_p3 = pnand %p1192_p2, %p1186_p13 }
  0x2b   : > { %1035 = vmatprep.mubr.msk.f32.mxu0 %vm295_vm0, %v287_v21  ;;  %1096 = vmatpush3.msra.mxu0 %v584_v20 }
  0x2c   : > { %1097 = vmatprep.subr.mxu0 %v583_v22 }
  0x2d   : > { %1098 = vmatpush3.msra.mxu0 %v583_v22 }
  0x2e   : > { %1036 = vmatmul.mubr.msk.f32.gmra.mxu0 %vm295_vm0, %v288_v23  ;;  %1099 = vmatprep.subr.mxu0 %v582_v24 }
  0x2f   : > { %1038 = vmatprep.mubr.msk.f32.mxu0 %vm295_vm0, %v289_v25  ;;  %1100 = vmatpush3.msra.mxu0 %v582_v24 }
  0x30   : > { %1101 = vmatprep.subr.mxu0 %v581_v26 }
  0x31   : > { %1102 = vmatpush3.msra.mxu0 %v581_v26 }
  0x32   : > { %1039 = vmatmul.mubr.msk.f32.gmra.mxu0 %vm295_vm0, %v290_v27  ;;  %1103 = vmatprep.subr.mxu0 %v580_v28 }
  0x33   : > { %1041 = vmatprep.mubr.msk.f32.mxu0 %vm295_vm0, %v291_v29  ;;  %1104 = vmatpush3.msra.mxu0 %v580_v28 }
  0x34   : > { %1105 = vmatprep.subr.mxu0 %v579_v30 }
  0x35   : > { %1106 = vmatpush3.msra.mxu0 %v579_v30 }
  0x36   : > { %1042 = vmatmul.mubr.msk.f32.gmra.mxu0 %vm295_vm0, %v292_v31  ;;  %1107 = vmatprep.subr.mxu0 %v578_v32 }
  0x37   : > { %1108 = vmatpush3.msra.mxu0 %v578_v32 }
  0x38   : > { %1109 = vmatprep.subr.mxu0 %v577_v33 }
  0x39   : > { %1110 = vmatpush3.msra.mxu0 %v577_v33 }
  0xda   : > { %v1467_v35 = vpop.f32.mrf.mxu0 }
  0xdb   : > { %490 = vst [vmem:[%s1469_s12 + $0x8] sm:$0xff] %v1467_v35 }
  0xdc   : > { %v1473_v36 = vpop.f32.mrf.mxu0 }
  0xdd   : > { %489 = vst [vmem:[%s1469_s12] sm:$0xff] %v1473_v36  ;;  %1111 = vmatprep.mubr.f32.mxu0 %v1473_v36 }
  0xde   : > { %v1478_v37 = vpop.f32.mrf.mxu0  ;;  %1112 = vmatmul.mubr.f32.vlgmr.msra.gmra.mxu0 %v1467_v35 }
  0xdf   : > { %492 = vst [vmem:[%s1469_s12 + $0x18] sm:$0xff] %v1478_v37 }
  0xe0   : > { %v1483_v38 = vpop.f32.mrf.mxu0 }
  0xe1   : > { %491 = vst [vmem:[%s1469_s12 + $0x10] sm:$0xff] %v1483_v38  ;;  %1114 = vmatprep.mubr.f32.mxu0 %v1483_v38 }
  0xe2   : > { %v1028_v39 = vpop.f32.mrf.mxu0  ;;  %1115 = vmatmul.mubr.f32.gmra.mxu0 %v1478_v37 }
  0xe3   : > { %494 = vst [vmem:[%s1469_s12 + $0x28] sm:$0xff] %v1028_v39 }
  0xe4   : > { %v430_v40 = vpop.f32.mrf.mxu0 }
  0xe5   : > { %493 = vst [vmem:[%s1469_s12 + $0x20] sm:$0xff] %v430_v40  ;;  %1117 = vmatprep.mubr.f32.mxu0 %v430_v40 }
  0xe6   : > { %v1031_v41 = vpop.f32.mrf.mxu0  ;;  %1118 = vmatmul.mubr.f32.gmra.mxu0 %v1028_v39 }
  0xe7   : > { %496 = vst [vmem:[%s1469_s12 + $0x38] sm:$0xff] %v1031_v41 }
  0xe8   : > { %v440_v42 = vpop.f32.mrf.mxu0 }
  0xe9   : > { %495 = vst [vmem:[%s1469_s12 + $0x30] sm:$0xff] %v440_v42  ;;  %1120 = vmatprep.mubr.f32.mxu0 %v440_v42 }
  0xea   : > { %v1034_v43 = vpop.f32.mrf.mxu0  ;;  %1121 = vmatmul.mubr.f32.gmra.mxu0 %v1031_v41 }
  0xeb   : > { %498 = vst [vmem:[%s1469_s12 + $0x48] sm:$0xff] %v1034_v43 }
  0xec   : > { %v450_v44 = vpop.f32.mrf.mxu0 }
  0xed   : > { %497 = vst [vmem:[%s1469_s12 + $0x40] sm:$0xff] %v450_v44  ;;  %1123 = vmatprep.mubr.f32.mxu0 %v450_v44 }
  0xee   : > { %v1037_v45 = vpop.f32.mrf.mxu0  ;;  %1124 = vmatmul.mubr.f32.gmra.mxu0 %v1034_v43 }
  0xef   : > { %500 = vst [vmem:[%s1469_s12 + $0x58] sm:$0xff] %v1037_v45 }
  0xf0   : > { %v460_v46 = vpop.f32.mrf.mxu0 }
  0xf1   : > { %499 = vst [vmem:[%s1469_s12 + $0x50] sm:$0xff] %v460_v46  ;;  %1126 = vmatprep.mubr.f32.mxu0 %v460_v46 }
  0xf2   : > { %v1040_v47 = vpop.f32.mrf.mxu0  ;;  %1127 = vmatmul.mubr.f32.gmra.mxu0 %v1037_v45 }
  0xf3   : > { %502 = vst [vmem:[%s1469_s12 + $0x68] sm:$0xff] %v1040_v47 }
  0xf4   : > { %v470_v48 = vpop.f32.mrf.mxu0 }
  0xf5   : > { %501 = vst [vmem:[%s1469_s12 + $0x60] sm:$0xff] %v470_v48  ;;  %1129 = vmatprep.mubr.f32.mxu0 %v470_v48 }
  0xf6   : > { %v1043_v49 = vpop.f32.mrf.mxu0  ;;  %1130 = vmatmul.mubr.f32.gmra.mxu0 %v1040_v47 }
  0xf7   : > { %504 = vst [vmem:[%s1469_s12 + $0x78] sm:$0xff] %v1043_v49  ;;  %1045 = vmatpush3.xpose.msra.mxu1 %v1043_v49 }
  0xf8   : > { %v480_v50 = vpop.f32.mrf.mxu0  ;;  %1046 = vmatprep.subr.mxu1 %v1275_v34 }
  0xf9   : > { %503 = vst [vmem:[%s1469_s12 + $0x70] sm:$0xff] %v480_v50  ;;  %1132 = vmatprep.mubr.f32.mxu0 %v480_v50 }
  0xfa   : > { %1133 = vmatmul.mubr.f32.gmra.mxu0 %v1043_v49 }
  0xfb   : > { %1047 = vmatpush3.xpose.msra.mxu1 %v480_v50 }
  0xfc   : > { %1048 = vmatprep.subr.mxu1 %v1275_v34 }
  0xff   : > { %1049 = vmatpush3.xpose.msra.mxu1 %v1040_v47 }
 0x100   : > { %1050 = vmatprep.subr.mxu1 %v1275_v34 }
 0x103   : > { %1051 = vmatpush3.xpose.msra.mxu1 %v470_v48 }
 0x104   : > { %1052 = vmatprep.subr.mxu1 %v1275_v34 }
 0x107   : > { %1053 = vmatpush3.xpose.msra.mxu1 %v1037_v45 }
 0x108   : > { %1054 = vmatprep.subr.mxu1 %v1275_v34 }
 0x10b   : > { %1055 = vmatpush3.xpose.msra.mxu1 %v460_v46 }
 0x10c   : > { %1056 = vmatprep.subr.mxu1 %v1275_v34 }
 0x10f   : > { %1057 = vmatpush3.xpose.msra.mxu1 %v1034_v43 }
 0x110   : > { %1058 = vmatprep.subr.mxu1 %v1275_v34 }
 0x113   : > { %1059 = vmatpush3.xpose.msra.mxu1 %v450_v44 }
 0x114   : > { %1060 = vmatprep.subr.mxu1 %v1275_v34 }
 0x117   : > { %1061 = vmatpush3.xpose.msra.mxu1 %v1031_v41 }
 0x118   : > { %1062 = vmatprep.subr.mxu1 %v1275_v34 }
 0x11b   : > { %1063 = vmatpush3.xpose.msra.mxu1 %v440_v42 }
 0x11c   : > { %1064 = vmatprep.subr.mxu1 %v1275_v34 }
 0x11f   : > { %1065 = vmatpush3.xpose.msra.mxu1 %v1028_v39 }
 0x120   : > { %1066 = vmatprep.subr.mxu1 %v1275_v34 }
 0x123   : > { %1067 = vmatpush3.xpose.msra.mxu1 %v430_v40 }
 0x124   : > { %1068 = vmatprep.subr.mxu1 %v1275_v34 }
 0x127   : > { %1069 = vmatpush3.xpose.msra.mxu1 %v1478_v37 }
 0x128   : > { %1070 = vmatprep.subr.mxu1 %v1275_v34 }
 0x12b   : > { %1071 = vmatpush3.xpose.msra.mxu1 %v1483_v38 }
 0x12c   : > { %1072 = vmatprep.subr.mxu1 %v1275_v34 }
 0x12f   : > { %1073 = vmatpush3.xpose.msra.mxu1 %v1467_v35 }
 0x130   : > { %1074 = vmatprep.subr.mxu1 %v1275_v34 }
 0x133   : > { %1075 = vmatpush3.xpose.msra.mxu1 %v1473_v36 }
 0x136   : > { %1077 = vmatmul.mubr.f32.vlgmr.msra.gmra.mxu1 %v505_v51 }
 0x137   : > { %1196 = shalt.err (!%p1193_p3)
}
 0x138   : > { %s1197_s12 = scalar_lea.hbm %s1527_s26, 2048  ;;  %s1201_s18 = scalar_lea.hbm %s1645_s4, 4096 }
 0x139   : > { %p1198_p4 = scmp.ne.s32.totalorder %s1527_s26, %s1197_s12  ;;  %p1202_p9 = scmp.lt.s32.totalorder %s1527_s26, %s1645_s4 }
 0x13a   : > { %p1203_p10 = scmp.lt.s32.totalorder %s1201_s18, %s1197_s12 }
 0x13b   : > { %p1199_p7 = pnand %p1198_p4, %p1354_p5 }
 0x13c   : > { %p1204_p11 = por %p1203_p10, %p1202_p9 }
 0x13d   : > { %p1200_p8 = pneg %p1199_p7 }
 0x13f   : > { %p1205_p12 = pnand %p1204_p11, %p1200_p8 }
 0x141   : > { %1208 = shalt.err (!%p1205_p12)
}
 0x142   : > { %s1278_s9 = smov 128   ;;  %s1279_s11 = smov 8   ;;  %vm738_vm2 = vcmask 64512  }
 0x143   : > { %1135 = dma.vmem_to_hbm [thread:$0]  (%p1354_p5), %s1530_s28, 2048, %s1527_s26, %s756_s29, %s1278_s9, %s1278_s9, %s1279_s11  }
 0x144   : > { %s1560_s17 = scalar_lea.vmem %s1647_s6, %s922_s16  ;;  %s920_s13 = sshll.u32 %s1464_s19, 3 }
 0x145   : > { %s256_s16 = scalar_lea.vmem [#allocation4], %s920_s13  ;;  %s945_s28 = sshll.u32 %s1337_s25, 7 }
 0x146   : > { %s795_s26 = sshll.u32 %s256_s16, 4  ;;  %s1601_s18 = scalar_lea.hbm %s1646_s5, %s945_s28  ;;  %s1596_s26 = int_to_ptr.vmem [resolvable:$true] %s795_s26 }
 0x147   : > { %s761_s20 = scalar_lea.sflag [#allocation5], %s1464_s19  ;;  %s1209_s10 = scalar_lea.vmem %s1596_s26, 128 }
 0x148   : > { %p1210_p13 = scmp.ne.s32.totalorder %s1596_s26, %s1209_s10  ;;  %s1280_s25 = smov [#allocation4]  }
 0x149   : > { %s1213_s9 = sshll.u32 %s1280_s25, 4  ;;  %s1214_s9 = int_to_ptr.vmem [resolvable:$false] %s1213_s9 }
 0x14a   : > { %p1211_p0 = pnand %p1210_p13, %p1354_p5  ;;  %s1215_s11 = scalar_lea.vmem %s1214_s9, 256 }
 0x14b   : > { %p1216_p2 = scmp.lt.s32.totalorder %s1596_s26, %s1214_s9  ;;  %p1217_p3 = scmp.lt.s32.totalorder %s1215_s11, %s1209_s10 }
 0x14c   : > { %p1212_p1 = pneg %p1211_p0 }
 0x14d   : > { %p1218_p4 = por %p1217_p3, %p1216_p2 }
 0x14f   : > { %p1219_p7 = pnand %p1218_p4, %p1212_p1 }
 0x19e   : > { %v1113_v52 = vpop.f32.mrf.mxu0 }
 0x19f   : > { %740 = vst.msk [vmem:[%s1560_s17 + $0x8] sm:$0xff] %vm738_vm2, %v1113_v52 }
 0x1a0   : > { %v659_v53 = vpop.f32.mrf.mxu0 }
 0x1a1   : > { %739 = vst.msk [vmem:[%s1560_s17] sm:$0xff] %vm738_vm2, %v659_v53 }
 0x1a2   : > { %v1116_v54 = vpop.f32.mrf.mxu0 }
 0x1a3   : > { %742 = vst.msk [vmem:[%s1560_s17 + $0x18] sm:$0xff] %vm738_vm2, %v1116_v54 }
 0x1a4   : > { %v669_v55 = vpop.f32.mrf.mxu0 }
 0x1a5   : > { %741 = vst.msk [vmem:[%s1560_s17 + $0x10] sm:$0xff] %vm738_vm2, %v669_v55 }
 0x1a6   : > { %v1119_v56 = vpop.f32.mrf.mxu0 }
 0x1a7   : > { %744 = vst.msk [vmem:[%s1560_s17 + $0x28] sm:$0xff] %vm738_vm2, %v1119_v56 }
 0x1a8   : > { %v679_v57 = vpop.f32.mrf.mxu0 }
 0x1a9   : > { %743 = vst.msk [vmem:[%s1560_s17 + $0x20] sm:$0xff] %vm738_vm2, %v679_v57 }
 0x1aa   : > { %v1122_v58 = vpop.f32.mrf.mxu0 }
 0x1ab   : > { %746 = vst.msk [vmem:[%s1560_s17 + $0x38] sm:$0xff] %vm738_vm2, %v1122_v58 }
 0x1ac   : > { %v689_v59 = vpop.f32.mrf.mxu0 }
 0x1ad   : > { %745 = vst.msk [vmem:[%s1560_s17 + $0x30] sm:$0xff] %vm738_vm2, %v689_v59 }
 0x1ae   : > { %v1125_v60 = vpop.f32.mrf.mxu0 }
 0x1af   : > { %748 = vst.msk [vmem:[%s1560_s17 + $0x48] sm:$0xff] %vm738_vm2, %v1125_v60 }
 0x1b0   : > { %v699_v61 = vpop.f32.mrf.mxu0 }
 0x1b1   : > { %747 = vst.msk [vmem:[%s1560_s17 + $0x40] sm:$0xff] %vm738_vm2, %v699_v61 }
 0x1b2   : > { %v1128_v62 = vpop.f32.mrf.mxu0 }
 0x1b3   : > { %750 = vst.msk [vmem:[%s1560_s17 + $0x58] sm:$0xff] %vm738_vm2, %v1128_v62 }
 0x1b4   : > { %v709_v63 = vpop.f32.mrf.mxu0 }
 0x1b5   : > { %749 = vst.msk [vmem:[%s1560_s17 + $0x50] sm:$0xff] %vm738_vm2, %v709_v63 }
 0x1b6   : > { %v1131_v0 = vpop.f32.mrf.mxu0 }
 0x1b7   : > { %752 = vst.msk [vmem:[%s1560_s17 + $0x68] sm:$0xff] %vm738_vm2, %v1131_v0 }
 0x1b8   : > { %v719_v1 = vpop.f32.mrf.mxu0 }
 0x1b9   : > { %751 = vst.msk [vmem:[%s1560_s17 + $0x60] sm:$0xff] %vm738_vm2, %v719_v1 }
 0x1ba   : > { %v1134_v2 = vpop.f32.mrf.mxu0 }
 0x1bb   : > { %754 = vst.msk [vmem:[%s1560_s17 + $0x78] sm:$0xff] %vm738_vm2, %v1134_v2 }
 0x1bc   : > { %v729_v3 = vpop.f32.mrf.mxu0 }
 0x1bd   : > { %753 = vst.msk [vmem:[%s1560_s17 + $0x70] sm:$0xff] %vm738_vm2, %v729_v3 }
 0x1f6   : > { %v572_v4 = vpop.f32.mrf.mxu1 }
 0x1f7   : > { %576 = vst [vmem:[%s256_s16] sm:$0xff] %v572_v4 }
 0x1f8   : > { %v1078_v5 = vpop.f32.mrf.mxu1 }
 0x1f9   : > { %1222 = shalt.err (!%p1219_p7)
}
 0x1fa   : > { %s1223_s14 = scalar_lea.hbm %s1601_s18, 128  ;;  %s1227_s17 = scalar_lea.hbm %s1646_s5, 256 }
 0x1fb   : > { %p1224_p8 = scmp.ne.s32.totalorder %s1601_s18, %s1223_s14  ;;  %p1228_p11 = scmp.lt.s32.totalorder %s1601_s18, %s1646_s5 }
 0x1fc   : > { %p1229_p12 = scmp.lt.s32.totalorder %s1227_s17, %s1223_s14 }
 0x1fd   : > { %p1225_p9 = pnand %p1224_p8, %p1354_p5 }
 0x1fe   : > { %p1230_p13 = por %p1229_p12, %p1228_p11 }
 0x1ff   : > { %p1226_p10 = pneg %p1225_p9 }
 0x201   : > { %p1231_p0 = pnand %p1230_p13, %p1226_p10 }
 0x203   : > { %1234 = shalt.err (!%p1231_p0)
}
 0x204   : > { %1136 = dma.vmem_to_hbm [thread:$0]  (%p1354_p5), %s1596_s26, 128, %s1601_s18, %s761_s20  }
 0x205 PF: > { %p1146_p1 = scmp.ge.s32.totalorder %s1273_s24, 2  ;;  %s811_s28 = sand.u32 1, %s1261_s21  }
 0x206   : > { %s812_s29 = scalar_lea.sflag [#allocation3], %s811_s28 }
 0x207   : > { %p1140_p2 = pnand %p1146_p1, %p1358_p6 }
 0x209   : > { %p1141_p3 = pneg %p1140_p2 }
 0x20b   : > { %1252 = dma.done.wait (%p1141_p3), %s812_s29, 2048  }
 0x20c   : > { %1254 = vsyncadd (%p1141_p3), %s812_s29, 4294965248  ;;  %s821_s12 = scalar_lea.sflag [#allocation5], %s811_s28 }
 0x20d   : > { %1256 = dma.done.wait (%p1141_p3), %s821_s12, 128  }
 0x20e   : > { %1258 = vsyncadd (%p1141_p3), %s821_s12, 4294967168  ;;  %p20_p5 = scmp.ge.s32.totalorder %s1341_s27, 4   ;;  %s1650_s21 = smov %s1265_s22 }
 0x20f   : > { %s1651_s22 = smov %s1269_s23  ;;  %s1652_s23 = smov %s1352_s30 }
 0x210   : > { %s1653_s24 = smov %s1341_s27  ;;  %22 = sbr.rel (!%p20_p5) target bundleno = 5 (0x5), region = 100 }
 0x215   :  { %834 = vsyncpa [#allocation3], 1 }
 0x216   :  { %836 = vsyncpa [#allocation3 + $0x1], 1 }
 0x217   :  { %837 = vsyncpa [#allocation5], 1 }
 0x218   :  { %839 = vsyncpa [#allocation5 + $0x1], 1 }

</bundles_post_ra>
